<compile_context>
chip_gen: v7x
topology: tpu7x:2x2x1
jax: 0.10.0
libtpu: 0.0.40
codegen_flags: <defaults>
</compile_context>

<pallas_src>
import math

import jax
import jax.numpy as jnp
from jax.experimental import pallas as pl
from jax.experimental.pallas import tpu as pltpu


def _mlp_kernel(xT_ref, p1_ref, p2_ref, outT_ref):
    # xT_ref : (x_dim, B_tile)      -- batch on lanes (lane-dense)
    # p1_ref : (width, x_dim + 1)   -- [:, :x_dim] = W1, [:, x_dim] = b1
    # p2_ref : (x_dim, width + 1)   -- [:, :width] = W2, [:, width] = b2
    # outT_ref: (x_dim, B_tile)
    x_dim = xT_ref.shape[0]
    width = p1_ref.shape[0]

    xT = xT_ref[...]                               # (x_dim, B_tile) f32
    w1 = p1_ref[:, :x_dim]                         # (width, x_dim)
    b1 = p1_ref[:, x_dim:x_dim + 1]                # (width, 1)

    # Hidden layer: K = x_dim is tiny -> VPU broadcast-FMAs (statically
    # unrolled) instead of paying MXU push/drain latency for a 2-deep matmul.
    acc = w1[:, 0:1] * xT[0:1, :] + b1             # (width, B_tile)
    for k in range(1, x_dim):                      # static unroll (x_dim small)
        acc = acc + w1[:, k:k + 1] * xT[k:k + 1, :]
    h = jax.nn.sigmoid(acc)                        # EUP, (width, B_tile)

    # Output layer: width-deep contraction on the MXU, B_tile output lanes.
    w2 = p2_ref[:, :width]                         # (x_dim, width)
    b2 = p2_ref[:, width:width + 1]                # (x_dim, 1)
    o = jnp.dot(w2, h, preferred_element_type=jnp.float32) + b2
    outT_ref[...] = o.astype(outT_ref.dtype)       # (x_dim, B_tile), lane-dense


def net_x_forward(x, w1, b1, w2, b2, *, block_b=256):
    """Fused forward pass of Net_X for a (stacked) batch.

    x : (B, x_dim) float32
    w1: (width, x_dim), b1: (width,)   -- nn.Linear(x_dim, width) layout
    w2: (x_dim, width), b2: (x_dim,)   -- nn.Linear(width, x_dim) layout
    returns (B, x_dim) float32

    Note: for a single tiny forward (B ~ 8) a plain jnp expression fused by
    XLA has lower overhead than any pallas_call; this path is meant for the
    stacked / training-loop case where many evaluations amortize one launch.
    """
    B, x_dim = x.shape
    width = w1.shape[0]

    # Pack parameters: one operand per layer (bias as an extra column).
    p1 = jnp.concatenate([w1, b1.reshape(width, 1)], axis=1).astype(jnp.float32)
    p2 = jnp.concatenate([w2, b2.reshape(x_dim, 1)], axis=1).astype(jnp.float32)

    # Lane-dense transposed layout: batch on the lane (last) axis.
    xT = x.astype(jnp.float32).T                   # (x_dim, B)
    num_tiles = pl.cdiv(B, block_b)
    B_pad = num_tiles * block_b
    if B_pad != B:
        xT = jnp.pad(xT, ((0, 0), (0, B_pad - B)))

    cost = pl.CostEstimate(
        flops=2 * B_pad * (x_dim * width + width * x_dim),
        transcendentals=B_pad * width,
        bytes_accessed=4 * (x_dim * B_pad * 2 + p1.size + p2.size),
    )

    outT = pl.pallas_call(
        _mlp_kernel,
        out_shape=jax.ShapeDtypeStruct((x_dim, B_pad), jnp.float32),
        grid=(num_tiles,),
        in_specs=[
            pl.BlockSpec((x_dim, block_b), lambda i: (0, i)),   # x streams
            pl.BlockSpec(p1.shape, lambda i: (0, 0)),           # weights resident
            pl.BlockSpec(p2.shape, lambda i: (0, 0)),           # weights resident
        ],
        out_specs=pl.BlockSpec((x_dim, block_b), lambda i: (0, i)),
        compiler_params=pltpu.CompilerParams(
            dimension_semantics=("parallel",)),                 # megacore / v7x 2-TC
        cost_estimate=cost,
    )(xT, p1, p2)

    return outT[:, :B].T                            # back to (B, x_dim)


def init_params(key, x_dim, width):
    """Deterministic init mirroring nn.Linear defaults (uniform +/- 1/sqrt(fan_in)),
    stored in native PyTorch layout."""
    k1, k2, k3, k4 = jax.random.split(key, 4)
    bound1 = 1.0 / math.sqrt(x_dim)
    bound2 = 1.0 / math.sqrt(width)
    w1 = jax.random.uniform(k1, (width, x_dim), jnp.float32, -bound1, bound1)
    b1 = jax.random.uniform(k2, (width,), jnp.float32, -bound1, bound1)
    w2 = jax.random.uniform(k3, (x_dim, width), jnp.float32, -bound2, bound2)
    b2 = jax.random.uniform(k4, (x_dim,), jnp.float32, -bound2, bound2)
    return w1, b1, w2, b2


if __name__ == "__main__":
    key = jax.random.PRNGKey(0)
    k_x, k_p = jax.random.split(key)

    # Gaussian-mixture experiment: x_dim=2 points, small hidden width.
    # Batch is a stack of evaluations (ragged vs. the 256-lane tile on purpose,
    # to exercise padding + a multi-step grid).
    batch, x_dim, width = 384, 2, 32
    x = jax.random.normal(k_x, (batch, x_dim), jnp.float32)
    w1, b1, w2, b2 = init_params(k_p, x_dim, width)

    out = net_x_forward(x, w1, b1, w2, b2)
    out = jax.block_until_ready(out)

    # Reference check in plain JAX (same math as the PyTorch module).
    ref = jax.nn.sigmoid(x @ w1.T + b1) @ w2.T + b2
    assert out.shape == (batch, x_dim)
    assert jnp.allclose(out, ref, atol=1e-5, rtol=1e-5)

    print("KERNEL_OK")
</pallas_src>

<mosaic_0001>
module attributes {stable_mosaic.version = 11 : i64} {
  func.func @_mlp_kernel(%arg0: i32, %arg1: memref<2x256xf32, #tpu.memory_space<vmem>>, %arg2: memref<32x3xf32, #tpu.memory_space<vmem>>, %arg3: memref<2x33xf32, #tpu.memory_space<vmem>>, %arg4: memref<2x256xf32, #tpu.memory_space<vmem>>) attributes {dimension_semantics = [#tpu.dimension_semantics<parallel>], iteration_bounds = array<i64: 2>, scalar_prefetch = 0 : i64, scratch_operands = 0 : i64, tpu.core_type = #tpu.core_type<tc>, window_params = [{transform_indices = @transform_0, window_bounds = array<i64: 2, 256>}, {pipeline_mode = #tpu.pipeline_mode<synchronous>, transform_indices = @transform_1, window_bounds = array<i64: 32, 3>}, {pipeline_mode = #tpu.pipeline_mode<synchronous>, transform_indices = @transform_2, window_bounds = array<i64: 2, 33>}, {transform_indices = @transform_3, window_bounds = array<i64: 2, 256>}]} {
    %c0 = arith.constant 0 : index
    %c0_0 = arith.constant 0 : index
    %0 = vector.load %arg1[%c0, %c0_0] : memref<2x256xf32, #tpu.memory_space<vmem>>, vector<2x256xf32>
    %c0_1 = arith.constant 0 : index
    %c0_2 = arith.constant 0 : index
    %1 = vector.load %arg2[%c0_1, %c0_2] : memref<32x3xf32, #tpu.memory_space<vmem>>, vector<32x2xf32>
    %c0_3 = arith.constant 0 : index
    %c2 = arith.constant 2 : index
    %2 = vector.load %arg2[%c0_3, %c2] : memref<32x3xf32, #tpu.memory_space<vmem>>, vector<32x1xf32>
    %3 = vector.extract_strided_slice %1 {offsets = [0, 0], sizes = [32, 1], strides = [1, 1]} : vector<32x2xf32> to vector<32x1xf32>
    %4 = vector.extract_strided_slice %0 {offsets = [0, 0], sizes = [1, 256], strides = [1, 1]} : vector<2x256xf32> to vector<1x256xf32>
    %5 = vector.broadcast %3 : vector<32x1xf32> to vector<32x256xf32>
    %6 = vector.broadcast %4 : vector<1x256xf32> to vector<32x256xf32>
    %7 = arith.mulf %5, %6 : vector<32x256xf32>
    %8 = vector.broadcast %2 : vector<32x1xf32> to vector<32x256xf32>
    %9 = arith.addf %7, %8 : vector<32x256xf32>
    %10 = vector.extract_strided_slice %1 {offsets = [0, 1], sizes = [32, 1], strides = [1, 1]} : vector<32x2xf32> to vector<32x1xf32>
    %11 = vector.extract_strided_slice %0 {offsets = [1, 0], sizes = [1, 256], strides = [1, 1]} : vector<2x256xf32> to vector<1x256xf32>
    %12 = vector.broadcast %10 : vector<32x1xf32> to vector<32x256xf32>
    %13 = vector.broadcast %11 : vector<1x256xf32> to vector<32x256xf32>
    %14 = arith.mulf %12, %13 : vector<32x256xf32>
    %15 = arith.addf %9, %14 : vector<32x256xf32>
    %16 = arith.negf %15 : vector<32x256xf32>
    %17 = math.exp %16 : vector<32x256xf32>
    %cst = arith.constant 1.000000e+00 : f32
    %18 = vector.broadcast %cst : f32 to vector<32x256xf32>
    %19 = arith.addf %18, %17 : vector<32x256xf32>
    %20 = arith.divf %18, %19 : vector<32x256xf32>
    %c0_4 = arith.constant 0 : index
    %c0_5 = arith.constant 0 : index
    %21 = vector.load %arg3[%c0_4, %c0_5] : memref<2x33xf32, #tpu.memory_space<vmem>>, vector<2x32xf32>
    %c0_6 = arith.constant 0 : index
    %c32 = arith.constant 32 : index
    %22 = vector.load %arg3[%c0_6, %c32] : memref<2x33xf32, #tpu.memory_space<vmem>>, vector<2x1xf32>
    %cst_7 = arith.constant dense<0.000000e+00> : vector<2x256xf32>
    %23 = tpu.matmul %21, %20, %cst_7 {dimension_numbers = #tpu.dot_dimension_numbers<[1], [0], [0], [1], [0, 0, 1, 1], [], []>} : vector<2x32xf32>, vector<32x256xf32>, vector<2x256xf32> -> vector<2x256xf32>
    %24 = vector.broadcast %22 : vector<2x1xf32> to vector<2x256xf32>
    %25 = arith.addf %23, %24 : vector<2x256xf32>
    %c0_8 = arith.constant 0 : index
    %c0_9 = arith.constant 0 : index
    %26 = vector.load %arg4[%c0_8, %c0_9] : memref<2x256xf32, #tpu.memory_space<vmem>>, vector<2x256xf32>
    tpu.vector_store %arg4[%c0_8, %c0_9], %25 {strides = array<i32>} : memref<2x256xf32, #tpu.memory_space<vmem>>, vector<2x256xf32>,
    return
  }
  func.func @transform_0(%arg0: i32) -> (i32, i32) {
    %c0_i32 = arith.constant 0 : i32
    %c0_i32_0 = arith.constant 0 : i32
    return %c0_i32, %arg0 : i32, i32
  }
  func.func @transform_1(%arg0: i32) -> (i32, i32) {
    %c0_i32 = arith.constant 0 : i32
    %c0_i32_0 = arith.constant 0 : i32
    %c0_i32_1 = arith.constant 0 : i32
    return %c0_i32, %c0_i32_0 : i32, i32
  }
  func.func @transform_2(%arg0: i32) -> (i32, i32) {
    %c0_i32 = arith.constant 0 : i32
    %c0_i32_0 = arith.constant 0 : i32
    %c0_i32_1 = arith.constant 0 : i32
    return %c0_i32, %c0_i32_0 : i32, i32
  }
  func.func @transform_3(%arg0: i32) -> (i32, i32) {
    %c0_i32 = arith.constant 0 : i32
    %c0_i32_0 = arith.constant 0 : i32
    return %c0_i32, %arg0 : i32, i32
  }
}

</mosaic_0001>

<bundles_post_ra>
// kernel: tpu_custom_call.1
= control target key start
LH: loop header
LB: loop body
LE: loop exit
PB: predicated region body
PF: predicated region fallthrough
CT: control target
= control target key end

     0   :  { %8 = vsyncpa [#allocation3], 0  ;;  %s836_s0 = inlined_call_operand.vmem [shape: f32[2,512], index: 0, kind: input, shape index: {}]   ;;  %s837_s1 = inlined_call_operand.vmem [shape: f32[32,3], index: 1, kind: input, shape index: {}]   ;;  %s838_s2 = inlined_call_operand.vmem [shape: f32[2,33], index: 2, kind: input, shape index: {}]   ;;  %s839_s3 = inlined_call_operand.hbm [shape: f32[2,512], index: 3, kind: output, shape index: {}]  }
   0x1   :  { %10 = vsyncpa [#allocation3 + $0x1], 0  ;;  %s718_s12 = smov 0   ;;  %s720_s13 = smov 0  }
   0x2   :  { %s722_s14 = smov 0   ;;  %s724_s15 = smov 0  }
   0x3 LB: > { %s739_s16 = sadd.s32 4294967295, %s690_s15   ;;  %s512_s17 = sadd.s32 4294967294, %s690_s15   ;;  %s690_s15 = sphi %s724_s15, %s845_s15   ;;  %s686_s14 = sphi %s722_s14, %s844_s14   ;;  %s682_s13 = sphi %s720_s13, %s843_s13   ;;  %s678_s12 = sphi %s718_s12, %s842_s12  }
   0x4   : > { %s743_s18 = sadd.s32 1, %s690_s15   ;;  %s91_s19 = sadd.s32 1, %s686_s14 }
   0x5   : > { %s88_s20 = ssub.s32 %s690_s15, %s743_s18  ;;  %p101_p0 = scmp.ne.s32.totalorder %s686_s14, %s682_s13 }
   0x6   : > { %p89_p1 = scmp.eq.s32.totalorder %s88_s20, 0  ;;  %p102_p2 = scmp.eq.s32.totalorder %s739_s16, 1 }
   0x7   : > { %p107_p3 = scmp.ne.s32.totalorder %s682_s13, %s678_s12  ;;  %p108_p4 = scmp.eq.s32.totalorder %s512_s17, 1 }
   0x8   : > { %s754_s21 = scalar_select %p89_p1, %s686_s14, %s91_s19  }
   0x9   : > { %p756_p5 = por %p102_p2, %p101_p0  ;;  %p760_p6 = por %p108_p4, %p107_p3 }
   0xa   : > { %p515_p7 = scmp.ge.s32.totalorder %s690_s15, 1  ;;  %p141_p8 = scmp.lt.s32.totalorder %s690_s15, 3 }
   0xc   : > { %p142_p9 = pnand %p515_p7, %p141_p8 }
   0xd   : > { %v173_v0 = vld [vmem:[%s837_s1] sm:$0xff] (!%p142_p9)  ;;  %v692_v1 = vmov (!%p142_p9), 2   ;;  %v693_v2 = vmov (!%p142_p9), 0   ;;  %v174_v3 = vld [vmem:[%s837_s1 + $0x8] sm:$0xff] (!%p142_p9)  ;;  %v176_v4 = vld [vmem:[%s837_s1 + $0x18] sm:$0xff] (!%p142_p9)  ;;  %v694_v5 = vmov (!%p142_p9), 1   ;;  %v198_v10 = vlaneseq (!%p142_p9) }
   0xe   : > { %145 = sbr.rel (%p142_p9) target bundleno = 439 (0x1b7), region = 32  ;;  %588 = vset.pattern.permute.xlu1 (!%p142_p9), %v692_v1  ;;  %587 = vset.pattern.permute.xlu0 (!%p142_p9), %v693_v2  ;;  %v175_v6 = vld [vmem:[%s837_s1 + $0x10] sm:$0xff] (!%p142_p9)  ;;  %v695_v7 = vmov (!%p142_p9), 0.0   ;;  %v781_v8 = vld [vmem:[%s838_s2] sm:$0x3] (!%p142_p9)  ;;  %v696_v9 = vmov (!%p142_p9), 32  }
   0xf   : > { %225 = vperm.xlu1 (!%p142_p9), %588, %v173_v0   ;;  %179 = vperm.xlu0 (!%p142_p9), %587, %v173_v0   ;;  %s517_s7 = sshll.u32 (!%p142_p9), %s739_s16, 1  ;;  %v199_v11 = vshrl.u32 (!%p142_p9), %v198_v10, 7  ;;  %vm352_vm0 = vcmask (!%p142_p9), 261120   ;;  %s162_s17 = sand.u32 (!%p142_p9), 1, %s682_s13  }
  0x10   : > { %419 = vmatprep.mubr.f32.mxu0 (!%p142_p9), %v695_v7  ;;  %p166_p10 = scmp.lt.s32.totalorder (!%p142_p9), %s517_s7, 3  ;;  %s516_s19 = sshll.u32 (!%p142_p9), %s162_s17, 2 }
  0x11   : > { %v200_v12 = vsub.s32 (!%p142_p9), 0, %v199_v11  ;;  %v204_v13 = vsub.s32 (!%p142_p9), 2, %v199_v11  ;;  %v266_v15 = vsub.s32 (!%p142_p9), 1, %v199_v11  ;;  %v270_v16 = vsub.s32 (!%p142_p9), 3, %v199_v11  ;;  %s534_s20 = sshll.u32 (!%p142_p9), %s739_s16, 6  ;;  %s164_s24 = scalar_lea.vmem (!%p142_p9), [#allocation2], %s516_s19 }
  0x12   : > { %s453_s25 = sshll.u32 (!%p142_p9), %s164_s24, 4  ;;  %s794_s28 = scalar_lea.hbm (!%p142_p9), %s839_s3, %s534_s20  ;;  %s796_s25 = int_to_ptr.vmem [resolvable:$true] %s453_s25 }
  0x13   : > { %229 = vperm.xlu1 (!%p142_p9), %588, %v174_v3   ;;  %184 = vperm.xlu0 (!%p142_p9), %587, %v174_v3   ;;  %s439_s29 = scalar_lea.sflag (!%p142_p9), [#allocation3], %s162_s17  ;;  %s628_s30 = scalar_lea.vmem (!%p142_p9), %s796_s25, 64 }
  0x14   : > { %p629_p11 = scmp.ne.s32.totalorder (!%p142_p9), %s796_s25, %s628_s30  ;;  %s697_s16 = smov (!%p142_p9), [#allocation2]  }
  0x15   : > { %s847_s7 = smov (!%p166_p10, %s517_s7), 3  ;;  %s632_s4 = sshll.u32 %s697_s16, 4  ;;  %s633_s4 = int_to_ptr.vmem [resolvable:$false] %s632_s4 }
  0x16   : > { %s518_s8 = sshll.u32 %s847_s7, 1  ;;  %p630_p12 = pnand %p629_p11, %p756_p5 }
  0x17   : > { %589 = vset.pattern.permute.xlu1 %v694_v5  ;;  %194 = vperm.xlu0 %587, %v176_v4   ;;  %s169_s11 = scalar_lea.vmem %s836_s0, %s518_s8  ;;  %s634_s5 = scalar_lea.vmem %s633_s4, 128 }
  0x18   : > { %253 = vperm.xlu1 %589, %v174_v3   ;;  %v172_v14 = vld [vmem:[%s169_s11] sm:$0xf]  ;;  %p631_p13 = pneg %p630_p12  ;;  %p635_p0 = scmp.lt.s32.totalorder %s796_s25, %s633_s4 }
  0x19   : > { %v201_v19 = vrot.slane %v172_v14, %v200_v12  ;;  %v205_v20 = vrot.slane %v172_v14, %v204_v13  ;;  %v267_v21 = vrot.slane %v172_v14, %v266_v15  ;;  %v271_v22 = vrot.slane %v172_v14, %v270_v16  ;;  %p636_p1 = scmp.lt.s32.totalorder %s634_s5, %s628_s30 }
  0x1b   : > { %591 = vset.pattern.permute.xlu0 %v694_v5  ;;  %v211_v23 = vrot.slane %v201_v19, %v200_v12  ;;  %v215_v24 = vrot.slane %v205_v20, %v200_v12  ;;  %v277_v29 = vrot.slane %v267_v21, %v266_v15  ;;  %v281_v30 = vrot.slane %v271_v22, %v266_v15  ;;  %p637_p2 = por %p636_p1, %p635_p0 }
  0x1c   : > { %590 = vset.pattern.permute.xlu1 %v693_v2  ;;  %249 = vperm.xlu0 %591, %v173_v0  }
  0x1d   : > { %189 = vperm.xlu1 %590, %v175_v6   ;;  %p638_p3 = pnand %p637_p2, %p631_p13 }
  0x20   : > { %257 = vperm.xlu0 %591, %v175_v6  }
  0x21   : > { %592 = vset.pattern.permute.xlu1 %v692_v1 }
  0x22   : > { %233 = vperm.xlu1 %592, %v175_v6  }
  0x24   : > { %595 = vset.pattern.permute.xlu0 %v696_v9 }
  0x26   : > { %237 = vperm.xlu1 %592, %v176_v4  }
  0x2a   : > { %593 = vset.pattern.permute.xlu1 %v694_v5 }
  0x2b   : > { %261 = vperm.xlu1 %593, %v176_v4  }
  0x2f   : > { %594 = vset.pattern.permute.xlu1 %v696_v9 }
  0x30   : > { %349 = vperm.xlu1 %594, %v781_v8  }
  0x8e   : > { %v226_v17 = vpop.permute.xlu1 %225  ;;  %v180_v18 = vpop.permute.xlu0 %179 }
  0x8f   : > { %v216_v32 = vmul.f32 %v211_v23, %v180_v18  ;;  %v217_v33 = vmul.f32 %v215_v24, %v180_v18 }
  0x91   : > { %v240_v41 = vadd.f32 %v226_v17, %v216_v32  ;;  %v241_v42 = vadd.f32 %v226_v17, %v217_v33 }
  0x92   : > { %v230_v25 = vpop.permute.xlu1 %229  ;;  %v185_v26 = vpop.permute.xlu0 %184 }
  0x93   : > { %v218_v27 = vmul.f32 %v211_v23, %v185_v26  ;;  %v219_v28 = vmul.f32 %v215_v24, %v185_v26 }
  0x95   : > { %v242_v35 = vadd.f32 %v230_v25, %v218_v27  ;;  %v243_v36 = vadd.f32 %v230_v25, %v219_v28 }
  0x96   : > { %v195_v31 = vpop.permute.xlu0 %194 }
  0x97   : > { %v254_v34 = vpop.permute.xlu1 %253  ;;  %v222_v2 = vmul.f32 %v211_v23, %v195_v31  ;;  %v223_v6 = vmul.f32 %v215_v24, %v195_v31 }
  0x98   : > { %v284_v37 = vmul.f32 %v277_v29, %v254_v34  ;;  %v285_v38 = vmul.f32 %v281_v30, %v254_v34 }
  0x9a   : > { %v292_v39 = vadd.f32 %v284_v37, %v242_v35  ;;  %v293_v40 = vadd.f32 %v285_v38, %v243_v36 }
  0x9b   : > { %v250_v43 = vpop.permute.xlu0 %249 }
  0x9c   : > { %v521_v44 = vmul.f32 -1.442695, %v292_v39  ;;  %v522_v45 = vmul.f32 -1.442695, %v293_v40  ;;  %v282_v46 = vmul.f32 %v277_v29, %v250_v43  ;;  %v283_v47 = vmul.f32 %v281_v30, %v250_v43  ;;  %v190_v48 = vpop.permute.xlu1 %189 }
  0x9d   : > { %v220_v51 = vmul.f32 %v211_v23, %v190_v48  ;;  %v221_v52 = vmul.f32 %v215_v24, %v190_v48 }
  0x9e   : > { %596 = vpow2.f32 %v521_v44  ;;  %v290_v49 = vadd.f32 %v282_v46, %v240_v41  ;;  %v291_v50 = vadd.f32 %v283_v47, %v241_v42 }
  0x9f   : > { %598 = vpow2.f32 %v522_v45  ;;  %v258_v53 = vpop.permute.xlu0 %257 }
  0xa0   : > { %v519_v54 = vmul.f32 -1.442695, %v290_v49  ;;  %v520_v55 = vmul.f32 -1.442695, %v291_v50  ;;  %v286_v56 = vmul.f32 %v277_v29, %v258_v53  ;;  %v287_v57 = vmul.f32 %v281_v30, %v258_v53 }
  0xa1   : > { %v234_v58 = vpop.permute.xlu1 %233 }
  0xa2   : > { %600 = vpow2.f32 %v519_v54  ;;  %v244_v59 = vadd.f32 %v234_v58, %v220_v51  ;;  %v245_v60 = vadd.f32 %v234_v58, %v221_v52 }
  0xa3   : > { %602 = vpow2.f32 %v520_v55 }
  0xa4   : > { %v294_v61 = vadd.f32 %v286_v56, %v244_v59  ;;  %v295_v62 = vadd.f32 %v287_v57, %v245_v60 }
  0xa5   : > { %v238_v63 = vpop.permute.xlu1 %237 }
  0xa6   : > { %v523_v0 = vmul.f32 -1.442695, %v294_v61  ;;  %v524_v3 = vmul.f32 -1.442695, %v295_v62  ;;  %v246_v9 = vadd.f32 %v238_v63, %v222_v2  ;;  %v247_v11 = vadd.f32 %v238_v63, %v223_v6 }
  0xa8   : > { %v597_v1 = vpop.eup %596  ;;  %604 = vpow2.f32 %v523_v0 }
  0xa9   : > { %v599_v4 = vpop.eup %598  ;;  %v324_v5 = vadd.f32 1.0, %v597_v1  ;;  %606 = vpow2.f32 %v524_v3 }
  0xaa   : > { %v325_v7 = vadd.f32 1.0, %v599_v4  ;;  %v262_v10 = vpop.permute.xlu1 %261 }
  0xab   : > { %v288_v12 = vmul.f32 %v277_v29, %v262_v10  ;;  %v289_v13 = vmul.f32 %v281_v30, %v262_v10  ;;  %608 = vrcp.f32 %v324_v5 }
  0xac   : > { %v601_v14 = vpop.eup %600  ;;  %610 = vrcp.f32 %v325_v7 }
  0xad   : > { %v603_v15 = vpop.eup %602  ;;  %v322_v16 = vadd.f32 1.0, %v601_v14  ;;  %v296_v17 = vadd.f32 %v288_v12, %v246_v9  ;;  %v297_v18 = vadd.f32 %v289_v13, %v247_v11 }
  0xae   : > { %v323_v19 = vadd.f32 1.0, %v603_v15 }
  0xaf   : > { %612 = vrcp.f32 %v322_v16  ;;  %v525_v20 = vmul.f32 -1.442695, %v296_v17  ;;  %v526_v21 = vmul.f32 -1.442695, %v297_v18  ;;  %v350_v42 = vpop.permute.xlu1 %349 }
  0xb0   : > { %614 = vrcp.f32 %v323_v19 }
  0xb1   : > { %616 = vpow2.f32 %v525_v20 }
  0xb2   : > { %618 = vpow2.f32 %v526_v21  ;;  %v605_v22 = vpop.eup %604 }
  0xb3   : > { %v607_v23 = vpop.eup %606  ;;  %v326_v26 = vadd.f32 1.0, %v605_v22 }
  0xb4   : > { %v327_v28 = vadd.f32 1.0, %v607_v23 }
  0xb5   : > { %v609_v24 = vpop.eup %608  ;;  %620 = vrcp.f32 %v326_v26 }
  0xb6   : > { %v611_v25 = vpop.eup %610  ;;  %622 = vrcp.f32 %v327_v28 }
  0xb9   : > { %v613_v27 = vpop.eup %612 }
  0xba   : > { %v615_v29 = vpop.eup %614  ;;  %v537_v30 = vpack.c.bf16 %v609_v24, %v613_v27 }
  0xbb   : > { %v617_v31 = vpop.eup %616  ;;  %v535_v32 = vpack.c.bf16 %v611_v25, %v615_v29 }
  0xbc   : > { %v619_v33 = vpop.eup %618  ;;  %v328_v34 = vadd.f32 1.0, %v617_v31 }
  0xbd   : > { %v329_v35 = vadd.f32 1.0, %v619_v33  ;;  %536 = vmatprep.subr.bf16.mxu0 %v535_v32 }
  0xbe   : > { %624 = vrcp.f32 %v328_v34  ;;  %538 = vmatpush1.bf16.msra.mxu0 %v537_v30 }
  0xbf   : > { %626 = vrcp.f32 %v329_v35  ;;  %v621_v36 = vpop.eup %620 }
  0xc0   : > { %v623_v37 = vpop.eup %622 }
  0xc8   : > { %v625_v38 = vpop.eup %624 }
  0xc9   : > { %v627_v39 = vpop.eup %626  ;;  %v541_v40 = vpack.c.bf16 %v625_v38, %v621_v36 }
  0xca   : > { %v539_v41 = vpack.c.bf16 %v627_v39, %v623_v37 }
  0xcc   : > { %540 = vmatprep.subr.bf16.mxu0 %v539_v41 }
  0xcd   : > { %542 = vmatpush1.bf16.msra.mxu0 %v541_v40 }
  0xd0   : > { %527 = vmatmul.mubr.msk.f32.vlgmr.msra.gmra.mrb[0].mxu0 %vm352_vm0, %v781_v8 }
 0x1a3   : > { %v421_v43 = vpop.f32.mrb[0].mxu0 }
 0x1a4   : > { %v422_v44 = vadd.f32 %v421_v43, %v350_v42  ;;  %v423_v45 = vpop.f32.mrb[1].mxu0 }
 0x1a5   : > { %v424_v46 = vadd.f32 %v423_v45, %v350_v42 }
 0x1a7   : > { %v428_v47 = vcombine.low %v422_v44, %v424_v46 }
 0x1a9   : > { %528 = vst.sshfl [vmem:[%s164_s24] sm:$0x33 pattern:$0x76325410] %v428_v47 }
 0x1aa   : > { %641 = shalt.err (!%p638_p3)
}
 0x1ab   : > { %s642_s6 = scalar_lea.hbm %s794_s28, 64  ;;  %s646_s9 = scalar_lea.hbm %s839_s3, 128 }
 0x1ac   : > { %p643_p4 = scmp.ne.s32.totalorder %s794_s28, %s642_s6  ;;  %p647_p9 = scmp.lt.u32.totalorder %s794_s28, %s839_s3 }
 0x1ad   : > { %p648_p10 = scmp.lt.u32.totalorder %s646_s9, %s642_s6  ;;  %p650_p12 = scmp.lt.u32.totalorder %s642_s6, %s794_s28 }
 0x1ae   : > { %p644_p7 = pnand %p643_p4, %p756_p5 }
 0x1af   : > { %p649_p11 = por %p648_p10, %p647_p9 }
 0x1b0   : > { %p645_p8 = pneg %p644_p7 }
 0x1b1   : > { %p651_p13 = por %p650_p12, %p649_p11 }
 0x1b3   : > { %p652_p0 = pnand %p651_p13, %p645_p8 }
 0x1b5   : > { %655 = shalt.err (!%p652_p0)
}
 0x1b6   : > { %543 = dma.vmem_to_hbm [thread:$0]  (%p756_p5), %s796_s25, 64, %s794_s28, %s439_s29  }
 0x1b7 PF: > { %p549_p1 = scmp.ge.s32.totalorder %s690_s15, 2  ;;  %s465_s17 = sand.u32 1, %s678_s12  }
 0x1b8   : > { %s466_s19 = scalar_lea.sflag [#allocation3], %s465_s17 }
 0x1b9   : > { %p546_p2 = pnand %p549_p1, %p760_p6 }
 0x1bb   : > { %673 = dma.done.wait (!%p546_p2), %s466_s19, 64  }
 0x1bc   : > { %675 = vsyncadd (!%p546_p2), %s466_s19, 4294967232  ;;  %p13_p3 = scmp.ge.s32.totalorder %s743_s18, 4   ;;  %s842_s12 = smov %s682_s13 }
 0x1bd   : > { %s843_s13 = smov %s686_s14  ;;  %s844_s14 = smov %s754_s21 }
 0x1be   : > { %s845_s15 = smov %s743_s18  ;;  %15 = sbr.rel (!%p13_p3) target bundleno = 3 (0x3), region = 67 }
 0x1c5   :  { %471 = vsyncpa [#allocation3], 1 }
 0x1c6   :  { %473 = vsyncpa [#allocation3 + $0x1], 1 }

</bundles_post_ra>
